<compile_context>
chip_gen: v6e
topology: v6e:2x2x1
jax: 0.10.0
libtpu: 0.0.40
codegen_flags: <defaults>
</compile_context>

<pallas_src>
import functools

import jax
import jax.numpy as jnp
import numpy as np
from jax.experimental import pallas as pl
from jax.experimental.pallas import tpu as pltpu


def _round_up(x, m):
    return ((x + m - 1) // m) * m


def _cdiv(a, b):
    return -(-a // b)


# --------------------------------------------------------------------------- #
# Kernel: one grid step = TM frames of x and x_hat -> (8, F) partial L1 sums. #
# --------------------------------------------------------------------------- #
def _spectral_kernel(fx_ref, fh_ref, basis_ref, out_ref):
    tm = fx_ref.shape[0]
    f_used = basis_ref.shape[1] // 2

    # Two MXU matmuls against the fused [cos | sin] basis (bf16 operands,
    # f32 accumulation).  No in-kernel concatenate of the two frame tiles.
    rx = jnp.dot(fx_ref[...], basis_ref[...], preferred_element_type=jnp.float32)
    rh = jnp.dot(fh_ref[...], basis_ref[...], preferred_element_type=jnp.float32)

    mag_x = jnp.sqrt(rx[:, :f_used] * rx[:, :f_used] + rx[:, f_used:] * rx[:, f_used:])
    mag_h = jnp.sqrt(rh[:, :f_used] * rh[:, :f_used] + rh[:, f_used:] * rh[:, f_used:])
    d = jnp.abs(mag_h - mag_x)                                   # (TM, F) f32

    # Sublane-tile-aligned partial reduction (VPU adds only).  Padded frame
    # rows and masked frequency columns are zero for BOTH operands, so they
    # contribute nothing to the sum.
    out_ref[...] = d.reshape(tm // 8, 8, f_used).sum(axis=0)     # (8, F)


# --------------------------------------------------------------------------- #
# Host-side helpers (run at trace time only — spectral_loss is jitted).       #
# --------------------------------------------------------------------------- #
@functools.lru_cache(maxsize=None)
def _dft_basis_np(n_fft, f_start, f_used):
    """Fused [cos | sin] real-DFT basis, built in float64 numpy, cached."""
    n = np.arange(n_fft, dtype=np.int64)[:, None]
    f = (np.arange(f_used, dtype=np.int64) + f_start)[None, :]
    k = (n * f) % n_fft                                   # keep angles in [0, 2*pi)
    ang = (2.0 * np.pi / n_fft) * k.astype(np.float64)
    n_freq = n_fft // 2 + 1
    mask = f < n_freq                                     # zero out padded freq lanes
    cos_m = np.where(mask, np.cos(ang), 0.0)
    sin_m = np.where(mask, np.sin(ang), 0.0)
    return np.concatenate([cos_m, sin_m], axis=1).astype(np.float32)


def _pick_tm_and_vmem():
    """Generation-gated tile size / VMEM budget (trace-time query)."""
    try:
        vmem = pltpu.get_tpu_info().vmem_capacity_bytes
    except Exception:
        vmem = 64 * 1024 * 1024
    if vmem >= 100 * 1024 * 1024:          # v5e / v6e: 128 MiB physical VMEM
        return 512, 64 * 1024 * 1024
    return 256, 40 * 1024 * 1024           # v7x: 64 MiB VMEM per TensorCore


def _frame(x, n_fft, hop):
    """torch.stft default framing: center=True, reflect pad, rectangular window."""
    B, T = x.shape
    pad = n_fft // 2
    if T < pad + 1:
        raise ValueError(
            f"reflect padding needs T >= n_fft//2 + 1 (got T={T}, n_fft={n_fft})")
    xp = jnp.pad(x, ((0, 0), (pad, pad)), mode="reflect")
    n_frames = 1 + T // hop
    if 4 * hop == n_fft:
        # Gather-free framing: 4 shifted hop-chunk views concatenated.
        nch = n_frames + 3
        chunks = xp[:, :nch * hop].reshape(B, nch, hop)
        frames = jnp.concatenate(
            [chunks[:, j:j + n_frames] for j in range(4)], axis=-1)
    else:
        idx = (jnp.arange(n_frames) * hop)[:, None] + jnp.arange(n_fft)[None, :]
        frames = xp[:, idx]
    return frames.reshape(B * n_frames, n_fft), xp, n_frames


def _frame_sums(xp, n_frames, hop):
    """Exact per-frame sums (DC bin) from hop-sized chunk sums of padded audio."""
    B = xp.shape[0]
    nch = n_frames + 3
    ch = xp[:, :nch * hop].astype(jnp.float32).reshape(B, nch, hop).sum(axis=-1)
    return (ch[:, 0:n_frames] + ch[:, 1:n_frames + 1]
            + ch[:, 2:n_frames + 2] + ch[:, 3:n_frames + 3])     # (B, n_frames)


# --------------------------------------------------------------------------- #
# Public entry point.                                                          #
# --------------------------------------------------------------------------- #
@functools.partial(jax.jit, static_argnames=("n_fft",))
def spectral_loss(x, x_hat, n_fft=1024):
    """x, x_hat: (B, 1, T) float32 -> scalar L1 loss between STFT magnitudes."""
    # bf16 before framing: the reflect pad / framing are exact copies, so this
    # only halves the wrapper-side HBM traffic (operands are bf16 for the MXU
    # anyway; accumulation stays f32).
    x = jnp.squeeze(x, axis=1).astype(jnp.bfloat16)
    x_hat = jnp.squeeze(x_hat, axis=1).astype(jnp.bfloat16)
    B, T = x.shape
    hop = n_fft // 4
    n_freq = n_fft // 2 + 1                   # onesided=True

    fx, xp, n_frames = _frame(x, n_fft, hop)
    fh, hp, _ = _frame(x_hat, n_fft, hop)

    # When n_fft//2 is a lane multiple, drop the n_freq -> round_up(n_freq,128)
    # padding: the matmul covers bins 1..n_fft//2 and the DC bin is handled
    # exactly in the wrapper (|frame sum|).
    handle_dc = n_fft >= 256 and (n_fft // 2) % 128 == 0
    if handle_dc:
        f_start, f_used = 1, n_fft // 2
        dc_x = jnp.abs(_frame_sums(xp, n_frames, hop))
        dc_h = jnp.abs(_frame_sums(hp, n_frames, hop))
        dc_sum = jnp.sum(jnp.abs(dc_h - dc_x))
    else:
        f_start, f_used = 0, _round_up(n_freq, 128)
        dc_sum = jnp.float32(0.0)

    basis = jnp.asarray(_dft_basis_np(n_fft, f_start, f_used), dtype=jnp.bfloat16)

    tm, vmem_limit = _pick_tm_and_vmem()

    # Tile the frame axis: cap at tm, force >=2 blocks when possible (v7x has
    # 2 TensorCores), and redistribute rows so zero-row padding is minimal.
    m = fx.shape[0]
    m16 = _round_up(m, 16)                    # bf16 sublane tile is 16 rows
    tm_cap = min(tm, m16)
    num_blocks = max(_cdiv(m16, tm_cap), 2 if m16 > 16 else 1)
    tm_eff = _round_up(_cdiv(m, num_blocks), 16)
    m_pad = num_blocks * tm_eff

    fx = jnp.pad(fx, ((0, m_pad - m), (0, 0)))
    fh = jnp.pad(fh, ((0, m_pad - m), (0, 0)))

    partials = pl.pallas_call(
        _spectral_kernel,
        out_shape=jax.ShapeDtypeStruct((num_blocks * 8, f_used), jnp.float32),
        grid_spec=pltpu.PrefetchScalarGridSpec(
            num_scalar_prefetch=0,
            grid=(num_blocks,),
            in_specs=[
                pl.BlockSpec((tm_eff, n_fft), lambda i: (i, 0)),
                pl.BlockSpec((tm_eff, n_fft), lambda i: (i, 0)),
                pl.BlockSpec((n_fft, 2 * f_used), lambda i: (0, 0)),
            ],
            out_specs=pl.BlockSpec((8, f_used), lambda i: (i, 0)),
        ),
        compiler_params=pltpu.CompilerParams(
            dimension_semantics=("parallel",),
            vmem_limit_bytes=vmem_limit,
        ),
    )(fx, fh, basis)

    n_elems = B * n_freq * n_frames           # true (unpadded) element count
    return (jnp.sum(partials) + dc_sum) / jnp.float32(n_elems)


def spectral_loss_ref(x, x_hat, n_fft=1024):
    """Pure-JAX f32 reference mirroring torch.stft(...).abs() + F.l1_loss."""
    x = jnp.squeeze(x, axis=1).astype(jnp.float32)
    x_hat = jnp.squeeze(x_hat, axis=1).astype(jnp.float32)
    hop = n_fft // 4
    fx, _, _ = _frame(x, n_fft, hop)
    fh, _, _ = _frame(x_hat, n_fft, hop)
    X = jnp.abs(jnp.fft.rfft(fx, n=n_fft, axis=-1))
    Xh = jnp.abs(jnp.fft.rfft(fh, n=n_fft, axis=-1))
    return jnp.mean(jnp.abs(Xh - X))


if __name__ == "__main__":
    key = jax.random.PRNGKey(0)
    k1, k2 = jax.random.split(key)

    # Two small configs: one exercises the masked-padding path (n_fft=128),
    # one exercises the default-n_fft path with the separate DC bin (1024).
    for (B, T, n_fft) in [(2, 256, 128), (2, 2048, 1024)]:
        x = jax.random.normal(k1, (B, 1, T), dtype=jnp.float32)
        x_hat = x + 0.1 * jax.random.normal(k2, (B, 1, T), dtype=jnp.float32)

        loss = jax.block_until_ready(spectral_loss(x, x_hat, n_fft=n_fft))
        ref = jax.block_until_ready(spectral_loss_ref(x, x_hat, n_fft=n_fft))
        np.testing.assert_allclose(np.asarray(loss), np.asarray(ref),
                                   rtol=2e-2, atol=1e-3)
    print("KERNEL_OK")
</pallas_src>

<mosaic_0001>
module attributes {stable_mosaic.version = 11 : i64} {
  func.func @_spectral_kernel(%arg0: i32, %arg1: memref<16x128xbf16, #tpu.memory_space<vmem>>, %arg2: memref<16x128xbf16, #tpu.memory_space<vmem>>, %arg3: memref<128x256xbf16, #tpu.memory_space<vmem>>, %arg4: memref<8x128xf32, #tpu.memory_space<vmem>>) attributes {dimension_semantics = [#tpu.dimension_semantics<parallel>], iteration_bounds = array<i64: 2>, scalar_prefetch = 0 : i64, scratch_operands = 0 : i64, tpu.core_type = #tpu.core_type<tc>, window_params = [{transform_indices = @transform_0, window_bounds = array<i64: 16, 128>}, {transform_indices = @transform_1, window_bounds = array<i64: 16, 128>}, {pipeline_mode = #tpu.pipeline_mode<synchronous>, transform_indices = @transform_2, window_bounds = array<i64: 128, 256>}, {transform_indices = @transform_3, window_bounds = array<i64: 8, 128>}]} {
    %c0 = arith.constant 0 : index
    %c0_0 = arith.constant 0 : index
    %0 = vector.load %arg1[%c0, %c0_0] : memref<16x128xbf16, #tpu.memory_space<vmem>>, vector<16x128xbf16>
    %c0_1 = arith.constant 0 : index
    %c0_2 = arith.constant 0 : index
    %1 = vector.load %arg3[%c0_1, %c0_2] : memref<128x256xbf16, #tpu.memory_space<vmem>>, vector<128x256xbf16>
    %cst = arith.constant dense<0.000000e+00> : vector<16x256xf32>
    %2 = tpu.matmul %0, %1, %cst {dimension_numbers = #tpu.dot_dimension_numbers<[1], [0], [0], [1], [0, 0, 1, 1], [], []>} : vector<16x128xbf16>, vector<128x256xbf16>, vector<16x256xf32> -> vector<16x256xf32>
    %c0_3 = arith.constant 0 : index
    %c0_4 = arith.constant 0 : index
    %3 = vector.load %arg2[%c0_3, %c0_4] : memref<16x128xbf16, #tpu.memory_space<vmem>>, vector<16x128xbf16>
    %c0_5 = arith.constant 0 : index
    %c0_6 = arith.constant 0 : index
    %4 = vector.load %arg3[%c0_5, %c0_6] : memref<128x256xbf16, #tpu.memory_space<vmem>>, vector<128x256xbf16>
    %cst_7 = arith.constant dense<0.000000e+00> : vector<16x256xf32>
    %5 = tpu.matmul %3, %4, %cst_7 {dimension_numbers = #tpu.dot_dimension_numbers<[1], [0], [0], [1], [0, 0, 1, 1], [], []>} : vector<16x128xbf16>, vector<128x256xbf16>, vector<16x256xf32> -> vector<16x256xf32>
    %6 = vector.extract_strided_slice %2 {offsets = [0, 0], sizes = [16, 128], strides = [1, 1]} : vector<16x256xf32> to vector<16x128xf32>
    %7 = vector.extract_strided_slice %2 {offsets = [0, 0], sizes = [16, 128], strides = [1, 1]} : vector<16x256xf32> to vector<16x128xf32>
    %8 = arith.mulf %6, %7 : vector<16x128xf32>
    %9 = vector.extract_strided_slice %2 {offsets = [0, 128], sizes = [16, 128], strides = [1, 1]} : vector<16x256xf32> to vector<16x128xf32>
    %10 = vector.extract_strided_slice %2 {offsets = [0, 128], sizes = [16, 128], strides = [1, 1]} : vector<16x256xf32> to vector<16x128xf32>
    %11 = arith.mulf %9, %10 : vector<16x128xf32>
    %12 = arith.addf %8, %11 : vector<16x128xf32>
    %13 = math.sqrt %12 : vector<16x128xf32>
    %14 = vector.extract_strided_slice %5 {offsets = [0, 0], sizes = [16, 128], strides = [1, 1]} : vector<16x256xf32> to vector<16x128xf32>
    %15 = vector.extract_strided_slice %5 {offsets = [0, 0], sizes = [16, 128], strides = [1, 1]} : vector<16x256xf32> to vector<16x128xf32>
    %16 = arith.mulf %14, %15 : vector<16x128xf32>
    %17 = vector.extract_strided_slice %5 {offsets = [0, 128], sizes = [16, 128], strides = [1, 1]} : vector<16x256xf32> to vector<16x128xf32>
    %18 = vector.extract_strided_slice %5 {offsets = [0, 128], sizes = [16, 128], strides = [1, 1]} : vector<16x256xf32> to vector<16x128xf32>
    %19 = arith.mulf %17, %18 : vector<16x128xf32>
    %20 = arith.addf %16, %19 : vector<16x128xf32>
    %21 = math.sqrt %20 : vector<16x128xf32>
    %22 = arith.subf %21, %13 : vector<16x128xf32>
    %23 = math.absf %22 : vector<16x128xf32>
    %24 = vector.shape_cast %23 : vector<16x128xf32> to vector<2x8x128xf32>
    %cst_8 = arith.constant dense<0.000000e+00> : vector<8x128xf32>
    %25 = vector.multi_reduction <add>, %24, %cst_8 [0] : vector<2x8x128xf32> to vector<8x128xf32>
    %c0_9 = arith.constant 0 : index
    %c0_10 = arith.constant 0 : index
    %26 = vector.load %arg4[%c0_9, %c0_10] : memref<8x128xf32, #tpu.memory_space<vmem>>, vector<8x128xf32>
    tpu.vector_store %arg4[%c0_9, %c0_10], %25 {strides = array<i32>} : memref<8x128xf32, #tpu.memory_space<vmem>>, vector<8x128xf32>,
    return
  }
  func.func @transform_0(%arg0: i32) -> (i32, i32) {
    %c0_i32 = arith.constant 0 : i32
    %c0_i32_0 = arith.constant 0 : i32
    return %arg0, %c0_i32 : i32, i32
  }
  func.func @transform_1(%arg0: i32) -> (i32, i32) {
    %c0_i32 = arith.constant 0 : i32
    %c0_i32_0 = arith.constant 0 : i32
    return %arg0, %c0_i32 : i32, i32
  }
  func.func @transform_2(%arg0: i32) -> (i32, i32) {
    %c0_i32 = arith.constant 0 : i32
    %c0_i32_0 = arith.constant 0 : i32
    %c0_i32_1 = arith.constant 0 : i32
    return %c0_i32, %c0_i32_0 : i32, i32
  }
  func.func @transform_3(%arg0: i32) -> (i32, i32) {
    %c0_i32 = arith.constant 0 : i32
    %c0_i32_0 = arith.constant 0 : i32
    return %arg0, %c0_i32 : i32, i32
  }
}

</mosaic_0001>

<bundles_post_ra>
// kernel: spectral_loss.1
= control target key start
LH: loop header
LB: loop body
LE: loop exit
PB: predicated region body
PF: predicated region fallthrough
CT: control target
= control target key end

     0   :  { %s605_s12 = smov 0   ;;  %s684_s0 = inlined_call_operand.vmem [shape: bf16[32,128], index: 0, kind: input, shape index: {}]   ;;  %s685_s1 = inlined_call_operand.vmem [shape: bf16[32,128], index: 1, kind: input, shape index: {}]   ;;  %s686_s2 = inlined_call_operand.vmem [shape: bf16[128,256], index: 2, kind: input, shape index: {}]   ;;  %s687_s3 = inlined_call_operand.vmem [shape: f32[16,128], index: 3, kind: output, shape index: {}]  }
   0x1 LB: > { %s611_s13 = sadd.s32 4294967295, %s582_s12   ;;  %p507_p0 = scmp.ge.s32.totalorder %s582_s12, 1  ;;  %s582_s12 = sphi %s605_s12, %s13_s12  }
   0x2   : > { %p149_p1 = scmp.lt.s32.totalorder %s582_s12, 3 }
   0x4   : > { %p150_p2 = pnand %p507_p0, %p149_p1 }
   0x5   : > { %s508_s16 = sshll.u32 (!%p150_p2), %s611_s13, 1  ;;  %p189_p4 = scmp.lt.s32.totalorder (!%p150_p2), %s611_s13, 1 }
   0x6   : > { %153 = sbr.rel (%p150_p2) target bundleno = 274 (0x112), region = 32  ;;  %p178_p3 = scmp.lt.s32.totalorder (!%p150_p2), %s508_s16, 3 }
   0xb   : > { %v542_v0 = vld [vmem:[%s686_s2 + $0x74] ss:$8 sps:$4 sm:$0xff]   ;;  %v544_v1 = vld [vmem:[%s686_s2 + $0x70] ss:$8 sps:$4 sm:$0xff]   ;;  %v584_v2 = vmov 0   ;;  %s689_s16 = smov (!%p178_p3, %s508_s16), 3 }
   0xc   : > { %330 = vmatprep.mubr.bf16.mxu0 %v584_v2  ;;  %381 = vmatprep.mubr.bf16.mxu1 %v584_v2  ;;  %v545_v3 = vld [vmem:[%s686_s2 + $0x64] ss:$8 sps:$4 sm:$0xff]   ;;  %v547_v4 = vld [vmem:[%s686_s2 + $0x60] ss:$8 sps:$4 sm:$0xff]   ;;  %v548_v5 = vld [vmem:[%s686_s2 + $0x54] ss:$8 sps:$4 sm:$0xff]  }
   0xd   : > { %298 = vmatprep.subr.bf16.mxu0 %v542_v0  ;;  %349 = vmatprep.subr.bf16.mxu1 %v542_v0  ;;  %s509_s25 = sshll.u32 %s689_s16, 2  ;;  %v550_v6 = vld [vmem:[%s686_s2 + $0x50] ss:$8 sps:$4 sm:$0xff]   ;;  %v551_v7 = vld [vmem:[%s686_s2 + $0x44] ss:$8 sps:$4 sm:$0xff]   ;;  %s691_s13 = smov (!%p189_p4, %s611_s13), 1 }
   0xe   : > { %299 = vmatpush1.bf16.msra.mxu0 %v544_v1  ;;  %350 = vmatpush1.bf16.msra.mxu1 %v544_v1  ;;  %s640_s5 = scalar_lea.vmem %s684_s0, %s509_s25  ;;  %s645_s8 = scalar_lea.vmem %s685_s1, %s509_s25  ;;  %v553_v8 = vld [vmem:[%s686_s2 + $0x40] ss:$8 sps:$4 sm:$0xff]   ;;  %v554_v9 = vld [vmem:[%s686_s2 + $0x34] ss:$8 sps:$4 sm:$0xff]   ;;  %v556_v10 = vld [vmem:[%s686_s2 + $0x30] ss:$8 sps:$4 sm:$0xff]  }
   0xf   : > { %300 = vmatprep.subr.bf16.mxu0 %v545_v3  ;;  %351 = vmatprep.subr.bf16.mxu1 %v545_v3  ;;  %v557_v11 = vld [vmem:[%s686_s2 + $0x24] ss:$8 sps:$4 sm:$0xff]   ;;  %v559_v12 = vld [vmem:[%s686_s2 + $0x20] ss:$8 sps:$4 sm:$0xff]   ;;  %v560_v13 = vld [vmem:[%s686_s2 + $0x14] ss:$8 sps:$4 sm:$0xff]  }
  0x10   : > { %v562_v14 = vld [vmem:[%s686_s2 + $0x10] ss:$8 sps:$4 sm:$0xff]   ;;  %v563_v15 = vld [vmem:[%s686_s2 + $0x4] ss:$8 sps:$4 sm:$0xff]   ;;  %v565_v16 = vld [vmem:[%s686_s2] ss:$8 sps:$4 sm:$0xff]  }
  0x11   : > { %v566_v17 = vld [vmem:[%s640_s5] sm:$0xff]   ;;  %s512_s29 = sshll.u32 %s691_s13, 3 }
  0x12   : > { %301 = vmatpush1.bf16.msra.mxu0 %v547_v4  ;;  %352 = vmatpush1.bf16.msra.mxu1 %v547_v4  ;;  %v567_v18 = vld [vmem:[%s645_s8] sm:$0xff]   ;;  %s192_s5 = scalar_lea.vmem %s687_s3, %s512_s29 }
  0x13   : > { %302 = vmatprep.subr.bf16.mxu0 %v548_v5  ;;  %353 = vmatprep.subr.bf16.mxu1 %v548_v5 }
  0x16   : > { %303 = vmatpush1.bf16.msra.mxu0 %v550_v6  ;;  %354 = vmatpush1.bf16.msra.mxu1 %v550_v6 }
  0x17   : > { %304 = vmatprep.subr.bf16.mxu0 %v551_v7  ;;  %355 = vmatprep.subr.bf16.mxu1 %v551_v7 }
  0x1a   : > { %305 = vmatpush1.bf16.msra.mxu0 %v553_v8  ;;  %356 = vmatpush1.bf16.msra.mxu1 %v553_v8 }
  0x1b   : > { %306 = vmatprep.subr.bf16.mxu0 %v554_v9  ;;  %357 = vmatprep.subr.bf16.mxu1 %v554_v9 }
  0x1e   : > { %307 = vmatpush1.bf16.msra.mxu0 %v556_v10  ;;  %358 = vmatpush1.bf16.msra.mxu1 %v556_v10 }
  0x1f   : > { %308 = vmatprep.subr.bf16.mxu0 %v557_v11  ;;  %359 = vmatprep.subr.bf16.mxu1 %v557_v11 }
  0x22   : > { %309 = vmatpush1.bf16.msra.mxu0 %v559_v12  ;;  %360 = vmatpush1.bf16.msra.mxu1 %v559_v12 }
  0x23   : > { %310 = vmatprep.subr.bf16.mxu0 %v560_v13  ;;  %361 = vmatprep.subr.bf16.mxu1 %v560_v13 }
  0x26   : > { %311 = vmatpush1.bf16.msra.mxu0 %v562_v14  ;;  %362 = vmatpush1.bf16.msra.mxu1 %v562_v14 }
  0x27   : > { %312 = vmatprep.subr.bf16.mxu0 %v563_v15  ;;  %363 = vmatprep.subr.bf16.mxu1 %v563_v15 }
  0x2a   : > { %313 = vmatpush1.bf16.msra.mxu0 %v565_v16  ;;  %364 = vmatpush1.bf16.msra.mxu1 %v565_v16 }
  0x2d   : > { %331 = vmatmul.mubr.bf16.vlgmr.msra.gmra.mxu0 %v566_v17  ;;  %382 = vmatmul.mubr.bf16.vlgmr.msra.gmra.mxu1 %v567_v18 }
  0xed   : > { %v332_v19 = vpop.f32.mrf.mxu0  ;;  %v383_v20 = vpop.f32.mrf.mxu1 }
  0xee   : > { %v392_v23 = vmul.f32 %v332_v19, %v332_v19  ;;  %v412_v24 = vmul.f32 %v383_v20, %v383_v20 }
  0xef   : > { %v334_v21 = vpop.f32.mrf.mxu0  ;;  %v385_v22 = vpop.f32.mrf.mxu1 }
  0xf0   : > { %v394_v25 = vmul.f32 %v334_v21, %v334_v21  ;;  %v414_v26 = vmul.f32 %v385_v22, %v385_v22 }
  0xf1   : > { %v336_v27 = vpop.f32.mrf.mxu0  ;;  %v387_v28 = vpop.f32.mrf.mxu1 }
  0xf2   : > { %v396_v29 = vadd.f32 %v394_v25, %v392_v23  ;;  %v416_v30 = vadd.f32 %v414_v26, %v412_v24  ;;  %v393_v33 = vmul.f32 %v336_v27, %v336_v27  ;;  %v413_v34 = vmul.f32 %v387_v28, %v387_v28 }
  0xf3   : > { %v338_v31 = vpop.f32.mrf.mxu0  ;;  %v389_v32 = vpop.f32.mrf.mxu1 }
  0xf4   : > { %568 = vrsqrt.f32 %v396_v29  ;;  %v395_v35 = vmul.f32 %v338_v31, %v338_v31  ;;  %v415_v36 = vmul.f32 %v389_v32, %v389_v32  ;;  %vm400_vm0 = vcmp.eq.f32.partialorder %v396_v29, inf }
  0xf5   : > { %570 = vrsqrt.f32 %v416_v30  ;;  %vm420_vm1 = vcmp.eq.f32.partialorder %v416_v30, inf  ;;  %v403_v45 = vand.u32 2147483648, %v396_v29  ;;  %v423_v46 = vand.u32 2147483648, %v416_v30 }
  0xf6   : > { %v397_v37 = vadd.f32 %v395_v35, %v393_v33  ;;  %v417_v38 = vadd.f32 %v415_v36, %v413_v34  ;;  %vm402_vm2 = vcmp.eq.f32.partialorder %v396_v29, 0.0  ;;  %vm422_vm3 = vcmp.eq.f32.partialorder %v416_v30, 0.0 }
  0xf8   : > { %572 = vrsqrt.f32 %v397_v37  ;;  %vm407_vm4 = vcmp.eq.f32.partialorder %v397_v37, inf  ;;  %v410_v52 = vand.u32 2147483648, %v397_v37  ;;  %vm409_vm5 = vcmp.eq.f32.partialorder %v397_v37, 0.0 }
  0xf9   : > { %574 = vrsqrt.f32 %v417_v38  ;;  %vm427_vm6 = vcmp.eq.f32.partialorder %v417_v38, inf  ;;  %v430_v55 = vand.u32 2147483648, %v417_v38  ;;  %vm429_vm7 = vcmp.eq.f32.partialorder %v417_v38, 0.0 }
 0x101   : > { %v569_v39 = vpop.eup %568 }
 0x102   : > { %v571_v40 = vpop.eup %570  ;;  %v399_v41 = vmul.f32 %v569_v39, %v396_v29 }
 0x103   : > { %v419_v42 = vmul.f32 %v571_v40, %v416_v30 }
 0x104   : > { %v401_v43 = vsel %vm400_vm0, %v396_v29, %v399_v41 }
 0x105   : > { %v421_v44 = vsel %vm420_vm1, %v416_v30, %v419_v42  ;;  %v573_v47 = vpop.eup %572  ;;  %v404_v49 = vsel %vm402_vm2, %v403_v45, %v401_v43 }
 0x106   : > { %v575_v48 = vpop.eup %574  ;;  %v424_v50 = vsel %vm422_vm3, %v423_v46, %v421_v44  ;;  %v406_v51 = vmul.f32 %v573_v47, %v397_v37 }
 0x107   : > { %v426_v53 = vmul.f32 %v575_v48, %v417_v38  ;;  %v432_v56 = vsub.f32 %v424_v50, %v404_v49 }
 0x108   : > { %v408_v54 = vsel %vm407_vm4, %v397_v37, %v406_v51 }
 0x109   : > { %v411_v57 = vsel %vm409_vm5, %v410_v52, %v408_v54  ;;  %v428_v58 = vsel %vm427_vm6, %v417_v38, %v426_v53  ;;  %v434_v61 = vand.u32 2147483647, %v432_v56 }
 0x10a   : > { %v431_v59 = vsel %vm429_vm7, %v430_v55, %v428_v58 }
 0x10b   : > { %v433_v60 = vsub.f32 %v431_v59, %v411_v57 }
 0x10d   : > { %v435_v62 = vand.u32 2147483647, %v433_v60 }
 0x10f   : > { %v436_v63 = vadd.f32 %v435_v62, %v434_v61 }
 0x111   : > { %437 = vst [vmem:[%s192_s5] sm:$0xff] %v436_v63 }
 0x112 PF: > { %s13_s12 = sadd.s32 1, %s582_s12  }
 0x113   : > { %p10_p5 = scmp.ge.s32.totalorder %s13_s12, 4  }
 0x115   :  { %12 = sbr.rel (!%p10_p5) target bundleno = 1 (0x1), region = 65 }

</bundles_post_ra>
